<compile_context>
chip_gen: v6e
topology: v6e:2x2x1
jax: 0.10.0
libtpu: 0.0.40
codegen_flags: <defaults>
</compile_context>

<pallas_src>
import jax
import jax.numpy as jnp
import numpy as np
from jax.experimental import pallas as pl
from jax.experimental.pallas import tpu as pltpu


_PLANE_BUDGET_ELEMS = 64 * 1024   # 256 KiB of f32 per channel-plane per step
_MAX_B = 32                       # cap on super-images per grid step


# ----------------------------------------------------------------------------
# Fold selection: fold F image rows into the lane axis -> folded plane
# (RR, FW) = (H // F, F * W).  Prefers FW % 128 == 0 (full, unmasked lanes).
# ----------------------------------------------------------------------------
def _pick_fold(H, W, max_lanes=512):
    best, best_aligned = 1, None
    for f in range(1, H + 1):
        if H % f:
            continue
        if f > 1 and H // f < 2:
            continue
        if f * W > max_lanes:
            continue
        best = f
        if (f * W) % 128 == 0:
            best_aligned = f
    return best_aligned if best_aligned is not None else best


# ----------------------------------------------------------------------------
# Static boundary masks of the packed folded plane (hoisted out of the kernel;
# passed as one resident (6, PR, FW) f32 input).
# ----------------------------------------------------------------------------
def _geometry_masks(W, RR, PR, FW):
    col = np.broadcast_to(np.arange(FW)[None, :], (PR, FW))
    row = np.broadcast_to(np.arange(PR)[:, None], (PR, FW))
    j_in_w = col % W                    # image column
    r_in_img = row % RR                 # folded row within its image
    is_left = j_in_w == 0               # image column 0
    is_right = j_in_w == W - 1          # image column W-1
    c_lo = col < W                      # vertical neighbour in previous folded row
    c_hi = col >= FW - W                # vertical neighbour in next folded row
    is_top = (r_in_img == 0) & c_lo     # image row 0
    is_bot = (r_in_img == RR - 1) & c_hi  # image row H-1
    m = np.stack([is_left, is_right, c_lo, c_hi, is_top, is_bot], axis=0)
    return jnp.asarray(m.astype(np.float32))


# ----------------------------------------------------------------------------
# Kernel factory (closes over static geometry / blocking parameters).
# ----------------------------------------------------------------------------
def _make_kernel(W, PR, FW, B, NB, n_steps, needs_mask, lane_roll_ok):

    def lane_shift(a, k):
        # out[..., c] = a[..., (c - k) % FW]; wrapped-in values are fixed up
        # with jnp.where below, so they are don't-cares.
        k = k % FW
        if k == 0:
            return a
        if lane_roll_ok:
            return pltpu.roll(a, k, axis=a.ndim - 1)     # XLU lane rotate
        return jnp.concatenate([a[..., FW - k:], a[..., :FW - k]], axis=-1)

    def row_prev(a):   # out[..., r, :] = a[..., r-1, :] (row 0 is a don't-care)
        return jnp.concatenate([a[..., :1, :], a[..., :-1, :]], axis=-2)

    def row_next(a):   # out[..., r, :] = a[..., r+1, :] (last row is a don't-care)
        return jnp.concatenate([a[..., 1:, :], a[..., -1:, :]], axis=-2)

    def kernel(masks_ref, yp_ref, yt_ref, sobel_acc_ref, color_acc_ref):
        step = pl.program_id(1)          # sequential ("arbitrary") axis

        @pl.when(step == 0)
        def _init():
            sobel_acc_ref[...] = jnp.zeros_like(sobel_acc_ref)
            color_acc_ref[...] = jnp.zeros_like(color_acc_ref)

        # Hoisted static geometry masks (resident input; 6 cheap compares).
        is_left = masks_ref[0] != 0.0
        is_right = masks_ref[1] != 0.0
        c_lo = masks_ref[2] != 0.0
        c_hi = masks_ref[3] != 0.0
        is_top = masks_ref[4] != 0.0
        is_bot = masks_ref[5] != 0.0

        def h_neighbors(a):
            # left/right image-column neighbours, BORDER_REFLECT_101.
            lraw = lane_shift(a, 1)      # a[..., c-1]
            rraw = lane_shift(a, -1)     # a[..., c+1]
            left = jnp.where(is_left, rraw, lraw)
            right = jnp.where(is_right, lraw, rraw)
            return left, right

        def v_neighbors(a):
            # up/down image-row neighbours, BORDER_REFLECT_101, on the folded +
            # sublane-packed layout: +-W lane shifts, row-shift fix at fold
            # boundaries; is_top/is_bot make cross-image wrap values don't-cares.
            uraw = lane_shift(a, W)      # a[..., c-W]  (same folded row)
            draw = lane_shift(a, -W)     # a[..., c+W]
            up = jnp.where(c_lo, row_prev(uraw), uraw)
            dn = jnp.where(c_hi, row_next(draw), draw)
            up, dn = jnp.where(is_top, dn, up), jnp.where(is_bot, up, dn)
            return up, dn

        def edge_maps(x):
            # x: (B, 3, PR, FW) in [0, 1]  ->  (sobelxy, color_edge)
            x = jnp.floor(jnp.clip(x.astype(jnp.float32) * 255.0, 0.0, 255.0))
            # cv2 RGB2GRAY fixed point: (R*4899 + G*9617 + B*1868 + 8192) >> 14
            gray = jnp.floor((x[:, 0] * 4899.0 + x[:, 1] * 9617.0 +
                              x[:, 2] * 1868.0 + 8192.0) * (1.0 / 16384.0))
            # Sobel ksize=1 ([-1,0,1]) + convertScaleAbs (|.| <= 255 already)
            gl, gr = h_neighbors(gray)
            gu, gd = v_neighbors(gray)
            # addWeighted(0.5, 0.5) + saturate_cast<uchar> (rint, half-to-even)
            sxy = jnp.round(0.5 * (jnp.abs(gr - gl) + jnp.abs(gd - gu)))
            # threshold(>10) -> GaussianBlur(3x3)!=0 keep mask, computed as the
            # exactly-equivalent separable 3x3 max-dilation of the binary mask.
            m = jnp.where(sxy > 10.0, 1.0, 0.0)
            ml, mr = h_neighbors(m)
            mh = jnp.maximum(m, jnp.maximum(ml, mr))
            mu, md = v_neighbors(mh)
            keep = jnp.maximum(mh, jnp.maximum(mu, md))
            return sxy, x * keep[:, None, :, :]

        # pred and true go through the same chain separately (no concat copy).
        p_sxy, p_ce = edge_maps(yp_ref[...])
        t_sxy, t_ce = edge_maps(yt_ref[...])

        sobel_diff = jnp.abs(p_sxy - t_sxy)                   # (B, PR, FW)
        color_diff = jnp.sum(jnp.abs(p_ce - t_ce), axis=1)    # (B, PR, FW)

        if needs_mask:
            # Mask super-images beyond NB (block tail / clamped megacore blocks).
            blk = pl.program_id(0) * n_steps + step
            b_idx = jax.lax.broadcasted_iota(jnp.int32, (B, PR, FW), 0)
            valid = (blk * B + b_idx) < NB
            sobel_diff = jnp.where(valid, sobel_diff, 0.0)
            color_diff = jnp.where(valid, color_diff, 0.0)

        sobel_acc_ref[...] = sobel_acc_ref[...] + jnp.sum(
            sobel_diff, axis=0, keepdims=True)
        color_acc_ref[...] = color_acc_ref[...] + jnp.sum(
            color_diff, axis=0, keepdims=True)

    return kernel


# ----------------------------------------------------------------------------
# Wrapper
# ----------------------------------------------------------------------------
@jax.jit
def color_sobel_loss_mean(y_pred, y_true):
    N, C, H, W = y_pred.shape
    assert C == 3 and H >= 2 and W >= 2, "expects NCHW RGB images, H,W >= 2"
    assert y_true.shape == y_pred.shape

    # Lane-dense fold: each (H, W) plane -> (RR, FW), FW preferably % 128 == 0.
    F = _pick_fold(H, W)
    RR, FW = H // F, F * W

    # Sublane packing: stack G images' folded planes so each channel plane has
    # PR = G*RR rows (fills vreg sublanes for tiny images).  Pick G to minimise
    # zero-padding (pad images have pred == true == 0 -> zero loss contribution).
    if RR >= 8:
        G = 1
    else:
        G = max(range(1, min(8 // RR, N) + 1),
                key=lambda g: (-(-(-N // g) * g), g))
    PR = G * RR
    NB = -(-N // G)        # super-images after packing
    Np = NB * G            # padded batch

    def pack(y):
        y = y.reshape(N, C, RR, FW)          # free row-major reshape
        if G == 1:
            return y
        if Np != N:
            y = jnp.pad(y, ((0, Np - N), (0, 0), (0, 0), (0, 0)))
        # Layout plumbing (one XLA transpose) to present sublane-dense planes.
        y = y.reshape(NB, G, C, RR, FW).transpose(0, 2, 1, 3, 4)
        return y.reshape(NB, C, PR, FW)

    yp = pack(y_pred)
    yt = pack(y_true)

    # B super-images per grid step: amortises per-step overhead + DMA descriptor
    # cost; budgeted so per-step VMEM stays far below the limit.
    max_b = max(1, min(_MAX_B, _PLANE_BUDGET_ELEMS // (PR * FW)))
    B = max(1, min(max_b, NB if NB < 2 else -(-NB // 2)))
    blocks_total = -(-NB // B)

    # 2-way "parallel" outer axis (v7x megacore) whenever there are >= 2 blocks;
    # odd/ragged splits handled by index clamping + in-kernel validity mask.
    n_par = 2 if blocks_total >= 2 else 1
    n_steps = -(-blocks_total // n_par)
    needs_clamp = (n_par * n_steps != blocks_total)
    needs_mask = needs_clamp or (blocks_total * B != NB)

    if needs_clamp:
        def img_map(p, i):
            return (jnp.minimum(p * n_steps + i, blocks_total - 1), 0, 0, 0)
    else:
        def img_map(p, i):
            return (p * n_steps + i, 0, 0, 0)

    masks = _geometry_masks(W, RR, PR, FW)
    lane_roll_ok = (FW % 128 == 0)
    kernel = _make_kernel(W, PR, FW, B, NB, n_steps, needs_mask, lane_roll_ok)

    acc_shape = jax.ShapeDtypeStruct((n_par, PR, FW), jnp.float32)
    sobel_acc, color_acc = pl.pallas_call(
        kernel,
        out_shape=(acc_shape, acc_shape),
        grid_spec=pltpu.PrefetchScalarGridSpec(
            num_scalar_prefetch=0,
            grid=(n_par, n_steps),
            in_specs=[
                # Static masks: constant block index -> stays resident, one DMA.
                pl.BlockSpec((6, PR, FW), lambda p, i: (0, 0, 0)),
                pl.BlockSpec((B, C, PR, FW), img_map),
                pl.BlockSpec((B, C, PR, FW), img_map),
            ],
            out_specs=[
                pl.BlockSpec((1, PR, FW), lambda p, i: (p, 0, 0)),
                pl.BlockSpec((1, PR, FW), lambda p, i: (p, 0, 0)),
            ],
        ),
        compiler_params=pltpu.CompilerParams(
            dimension_semantics=("parallel", "arbitrary"),
            vmem_limit_bytes=48 * 1024 * 1024,
        ),
    )(masks, yp, yt)

    # Single final cross-lane reduction + the hoisted /255 and mean division.
    loss_sobel = jnp.sum(sobel_acc) / (255.0 * N * H * W)
    loss_color_edge = jnp.sum(color_acc) / (255.0 * N * C * H * W)
    return loss_sobel, loss_color_edge


# ----------------------------------------------------------------------------
# Independent pure-JAX reference (pad-based, mirrors the cv2 pipeline 1:1).
# ----------------------------------------------------------------------------
def _reflect101_pad(a):
    a = jnp.concatenate([a[1:2, :], a, a[-2:-1, :]], axis=0)
    a = jnp.concatenate([a[:, 1:2], a, a[:, -2:-1]], axis=1)
    return a


def _color_sobel_image(x):
    x = jnp.floor(jnp.clip(x, 0.0, 255.0))
    r, g, b = x[0], x[1], x[2]
    gray = jnp.floor((r * 4899.0 + g * 9617.0 + b * 1868.0 + 8192.0) * (1.0 / 16384.0))
    gp = _reflect101_pad(gray)
    sx = jnp.minimum(jnp.abs(gp[1:-1, 2:] - gp[1:-1, :-2]), 255.0)
    sy = jnp.minimum(jnp.abs(gp[2:, 1:-1] - gp[:-2, 1:-1]), 255.0)
    sxy = jnp.clip(jnp.round(0.5 * sx + 0.5 * sy), 0.0, 255.0)
    mask = jnp.where(sxy > 10.0, 255.0, 0.0)
    mp = _reflect101_pad(mask)
    rowp = 0.25 * mp[:, :-2] + 0.5 * mp[:, 1:-1] + 0.25 * mp[:, 2:]
    blur = jnp.round(0.25 * rowp[:-2, :] + 0.5 * rowp[1:-1, :] + 0.25 * rowp[2:, :])
    keep = blur != 0.0
    color_edge = jnp.where(keep[None, :, :], x, 0.0)
    return sxy, color_edge


def _reference(y_pred, y_true):
    def per_image(xp, xt):
        p_sxy, p_ce = _color_sobel_image(xp * 255.0)
        t_sxy, t_ce = _color_sobel_image(xt * 255.0)
        return (jnp.sum(jnp.abs((p_sxy - t_sxy) / 255.0)),
                jnp.sum(jnp.abs((p_ce - t_ce) / 255.0)))
    s, c = jax.vmap(per_image)(y_pred, y_true)
    N, C, H, W = y_pred.shape
    return jnp.sum(s) / (N * H * W), jnp.sum(c) / (N * H * W * C)


if __name__ == "__main__":
    key = jax.random.PRNGKey(0)
    k1, k2 = jax.random.split(key)
    # Module has no learnable parameters; inputs are images in [0, 1], NCHW RGB.
    y_pred = jax.random.uniform(k1, (2, 3, 16, 16), dtype=jnp.float32)
    y_true = jax.random.uniform(k2, (2, 3, 16, 16), dtype=jnp.float32)

    loss_sobel, loss_color_edge = color_sobel_loss_mean(y_pred, y_true)
    jax.block_until_ready((loss_sobel, loss_color_edge))

    ref_s, ref_c = _reference(y_pred, y_true)
    np.testing.assert_allclose(np.asarray(loss_sobel), np.asarray(ref_s),
                               rtol=1e-5, atol=1e-6)
    np.testing.assert_allclose(np.asarray(loss_color_edge), np.asarray(ref_c),
                               rtol=1e-5, atol=1e-6)
    print("KERNEL_OK")
</pallas_src>

<mosaic_0001>
module attributes {stable_mosaic.version = 11 : i64} {
  func.func @kernel(%arg0: i32, %arg1: i32, %arg2: memref<6x4x128xf32, #tpu.memory_space<vmem>>, %arg3: memref<1x3x4x128xf32, #tpu.memory_space<vmem>>, %arg4: memref<1x3x4x128xf32, #tpu.memory_space<vmem>>, %arg5: memref<1x4x128xf32, #tpu.memory_space<vmem>>, %arg6: memref<1x4x128xf32, #tpu.memory_space<vmem>>) attributes {dimension_semantics = [#tpu.dimension_semantics<parallel>, #tpu.dimension_semantics<arbitrary>], iteration_bounds = array<i64: 1, 1>, scalar_prefetch = 0 : i64, scratch_operands = 0 : i64, tpu.core_type = #tpu.core_type<tc>, window_params = [{pipeline_mode = #tpu.pipeline_mode<synchronous>, transform_indices = @transform_0, window_bounds = array<i64: 6, 4, 128>}, {transform_indices = @transform_1, window_bounds = array<i64: 1, 3, 4, 128>}, {transform_indices = @transform_2, window_bounds = array<i64: 1, 3, 4, 128>}, {transform_indices = @transform_3, window_bounds = array<i64: 1, 4, 128>}, {transform_indices = @transform_4, window_bounds = array<i64: 1, 4, 128>}]} {
    %c0_i32 = arith.constant 0 : i32
    %0 = arith.cmpi eq, %arg1, %c0_i32 : i32
    %1 = arith.extui %0 : i1 to i32
    %c0_i32_0 = arith.constant 0 : i32
    %2 = arith.cmpi ne, %1, %c0_i32_0 : i32
    scf.if %2 {
      %cst_77 = arith.constant 0.000000e+00 : f32
      %224 = vector.broadcast %cst_77 : f32 to vector<1x4x128xf32>
      %c0_78 = arith.constant 0 : index
      %c0_79 = arith.constant 0 : index
      %c0_80 = arith.constant 0 : index
      %225 = vector.load %arg5[%c0_78, %c0_79, %c0_80] : memref<1x4x128xf32, #tpu.memory_space<vmem>>, vector<1x4x128xf32>
      tpu.vector_store %arg5[%c0_78, %c0_79, %c0_80], %224 {strides = array<i32>} : memref<1x4x128xf32, #tpu.memory_space<vmem>>, vector<1x4x128xf32>,
      %cst_81 = arith.constant 0.000000e+00 : f32
      %226 = vector.broadcast %cst_81 : f32 to vector<1x4x128xf32>
      %c0_82 = arith.constant 0 : index
      %c0_83 = arith.constant 0 : index
      %c0_84 = arith.constant 0 : index
      %227 = vector.load %arg6[%c0_82, %c0_83, %c0_84] : memref<1x4x128xf32, #tpu.memory_space<vmem>>, vector<1x4x128xf32>
      tpu.vector_store %arg6[%c0_82, %c0_83, %c0_84], %226 {strides = array<i32>} : memref<1x4x128xf32, #tpu.memory_space<vmem>>, vector<1x4x128xf32>,
    } else {
    }
    %c0 = arith.constant 0 : index
    %c0_1 = arith.constant 0 : index
    %c0_2 = arith.constant 0 : index
    %3 = vector.load %arg2[%c0, %c0_1, %c0_2] : memref<6x4x128xf32, #tpu.memory_space<vmem>>, vector<1x4x128xf32>
    %4 = vector.shape_cast %3 : vector<1x4x128xf32> to vector<4x128xf32>
    %cst = arith.constant 0.000000e+00 : f32
    %5 = vector.broadcast %cst : f32 to vector<4x128xf32>
    %6 = arith.cmpf one, %4, %5 : vector<4x128xf32>
    %c1 = arith.constant 1 : index
    %c0_3 = arith.constant 0 : index
    %c0_4 = arith.constant 0 : index
    %7 = vector.load %arg2[%c1, %c0_3, %c0_4] : memref<6x4x128xf32, #tpu.memory_space<vmem>>, vector<1x4x128xf32>
    %8 = vector.shape_cast %7 : vector<1x4x128xf32> to vector<4x128xf32>
    %cst_5 = arith.constant 0.000000e+00 : f32
    %9 = vector.broadcast %cst_5 : f32 to vector<4x128xf32>
    %10 = arith.cmpf one, %8, %9 : vector<4x128xf32>
    %c2 = arith.constant 2 : index
    %c0_6 = arith.constant 0 : index
    %c0_7 = arith.constant 0 : index
    %11 = vector.load %arg2[%c2, %c0_6, %c0_7] : memref<6x4x128xf32, #tpu.memory_space<vmem>>, vector<1x4x128xf32>
    %12 = vector.shape_cast %11 : vector<1x4x128xf32> to vector<4x128xf32>
    %cst_8 = arith.constant 0.000000e+00 : f32
    %13 = vector.broadcast %cst_8 : f32 to vector<4x128xf32>
    %14 = arith.cmpf one, %12, %13 : vector<4x128xf32>
    %c3 = arith.constant 3 : index
    %c0_9 = arith.constant 0 : index
    %c0_10 = arith.constant 0 : index
    %15 = vector.load %arg2[%c3, %c0_9, %c0_10] : memref<6x4x128xf32, #tpu.memory_space<vmem>>, vector<1x4x128xf32>
    %16 = vector.shape_cast %15 : vector<1x4x128xf32> to vector<4x128xf32>
    %cst_11 = arith.constant 0.000000e+00 : f32
    %17 = vector.broadcast %cst_11 : f32 to vector<4x128xf32>
    %18 = arith.cmpf one, %16, %17 : vector<4x128xf32>
    %c4 = arith.constant 4 : index
    %c0_12 = arith.constant 0 : index
    %c0_13 = arith.constant 0 : index
    %19 = vector.load %arg2[%c4, %c0_12, %c0_13] : memref<6x4x128xf32, #tpu.memory_space<vmem>>, vector<1x4x128xf32>
    %20 = vector.shape_cast %19 : vector<1x4x128xf32> to vector<4x128xf32>
    %cst_14 = arith.constant 0.000000e+00 : f32
    %21 = vector.broadcast %cst_14 : f32 to vector<4x128xf32>
    %22 = arith.cmpf one, %20, %21 : vector<4x128xf32>
    %c5 = arith.constant 5 : index
    %c0_15 = arith.constant 0 : index
    %c0_16 = arith.constant 0 : index
    %23 = vector.load %arg2[%c5, %c0_15, %c0_16] : memref<6x4x128xf32, #tpu.memory_space<vmem>>, vector<1x4x128xf32>
    %24 = vector.shape_cast %23 : vector<1x4x128xf32> to vector<4x128xf32>
    %cst_17 = arith.constant 0.000000e+00 : f32
    %25 = vector.broadcast %cst_17 : f32 to vector<4x128xf32>
    %26 = arith.cmpf one, %24, %25 : vector<4x128xf32>
    %c0_18 = arith.constant 0 : index
    %c0_19 = arith.constant 0 : index
    %c0_20 = arith.constant 0 : index
    %c0_21 = arith.constant 0 : index
    %27 = vector.load %arg3[%c0_18, %c0_19, %c0_20, %c0_21] : memref<1x3x4x128xf32, #tpu.memory_space<vmem>>, vector<1x3x4x128xf32>
    %cst_22 = arith.constant 2.550000e+02 : f32
    %28 = vector.broadcast %cst_22 : f32 to vector<1x3x4x128xf32>
    %29 = arith.mulf %27, %28 : vector<1x3x4x128xf32>
    %cst_23 = arith.constant 0.000000e+00 : f32
    %cst_24 = arith.constant 2.550000e+02 : f32
    %30 = vector.broadcast %cst_23 : f32 to vector<1x3x4x128xf32>
    %31 = arith.maximumf %30, %29 : vector<1x3x4x128xf32>
    %32 = vector.broadcast %cst_24 : f32 to vector<1x3x4x128xf32>
    %33 = arith.minimumf %32, %31 : vector<1x3x4x128xf32>
    %34 = math.floor %33 : vector<1x3x4x128xf32>
    %35 = vector.extract_strided_slice %34 {offsets = [0, 0, 0, 0], sizes = [1, 1, 4, 128], strides = [1, 1, 1, 1]} : vector<1x3x4x128xf32> to vector<1x1x4x128xf32>
    %36 = vector.shape_cast %35 : vector<1x1x4x128xf32> to vector<1x4x128xf32>
    %cst_25 = arith.constant 4.899000e+03 : f32
    %37 = vector.broadcast %cst_25 : f32 to vector<1x4x128xf32>
    %38 = arith.mulf %36, %37 : vector<1x4x128xf32>
    %39 = vector.extract_strided_slice %34 {offsets = [0, 1, 0, 0], sizes = [1, 1, 4, 128], strides = [1, 1, 1, 1]} : vector<1x3x4x128xf32> to vector<1x1x4x128xf32>
    %40 = vector.shape_cast %39 : vector<1x1x4x128xf32> to vector<1x4x128xf32>
    %cst_26 = arith.constant 9.617000e+03 : f32
    %41 = vector.broadcast %cst_26 : f32 to vector<1x4x128xf32>
    %42 = arith.mulf %40, %41 : vector<1x4x128xf32>
    %43 = arith.addf %38, %42 : vector<1x4x128xf32>
    %44 = vector.extract_strided_slice %34 {offsets = [0, 2, 0, 0], sizes = [1, 1, 4, 128], strides = [1, 1, 1, 1]} : vector<1x3x4x128xf32> to vector<1x1x4x128xf32>
    %45 = vector.shape_cast %44 : vector<1x1x4x128xf32> to vector<1x4x128xf32>
    %cst_27 = arith.constant 1.868000e+03 : f32
    %46 = vector.broadcast %cst_27 : f32 to vector<1x4x128xf32>
    %47 = arith.mulf %45, %46 : vector<1x4x128xf32>
    %48 = arith.addf %43, %47 : vector<1x4x128xf32>
    %cst_28 = arith.constant 8.192000e+03 : f32
    %49 = vector.broadcast %cst_28 : f32 to vector<1x4x128xf32>
    %50 = arith.addf %48, %49 : vector<1x4x128xf32>
    %cst_29 = arith.constant 6.10351563E-5 : f32
    %51 = vector.broadcast %cst_29 : f32 to vector<1x4x128xf32>
    %52 = arith.mulf %50, %51 : vector<1x4x128xf32>
    %53 = math.floor %52 : vector<1x4x128xf32>
    %c1_i32 = arith.constant 1 : i32
    %54 = tpu.dynamic_rotate %53 by %c1_i32 dim 2 : vector<1x4x128xf32>, i32 -> vector<1x4x128xf32>
    %c127_i32 = arith.constant 127 : i32
    %55 = tpu.dynamic_rotate %53 by %c127_i32 dim 2 : vector<1x4x128xf32>, i32 -> vector<1x4x128xf32>
    %56 = vector.shape_cast %6 : vector<4x128xi1> to vector<1x4x128xi1>
    %57 = arith.select %56, %55, %54 : vector<1x4x128xi1>, vector<1x4x128xf32>
    %58 = vector.shape_cast %10 : vector<4x128xi1> to vector<1x4x128xi1>
    %59 = arith.select %58, %54, %55 : vector<1x4x128xi1>, vector<1x4x128xf32>
    %c16_i32 = arith.constant 16 : i32
    %60 = tpu.dynamic_rotate %53 by %c16_i32 dim 2 : vector<1x4x128xf32>, i32 -> vector<1x4x128xf32>
    %c112_i32 = arith.constant 112 : i32
    %61 = tpu.dynamic_rotate %53 by %c112_i32 dim 2 : vector<1x4x128xf32>, i32 -> vector<1x4x128xf32>
    %62 = vector.extract_strided_slice %60 {offsets = [0, 0, 0], sizes = [1, 1, 128], strides = [1, 1, 1]} : vector<1x4x128xf32> to vector<1x1x128xf32>
    %63 = vector.extract_strided_slice %60 {offsets = [0, 0, 0], sizes = [1, 3, 128], strides = [1, 1, 1]} : vector<1x4x128xf32> to vector<1x3x128xf32>
    %64 = tpu.concatenate %62, %63 in 1 : vector<1x1x128xf32>, vector<1x3x128xf32> -> vector<1x4x128xf32>
    %65 = vector.shape_cast %14 : vector<4x128xi1> to vector<1x4x128xi1>
    %66 = arith.select %65, %64, %60 : vector<1x4x128xi1>, vector<1x4x128xf32>
    %67 = vector.extract_strided_slice %61 {offsets = [0, 1, 0], sizes = [1, 3, 128], strides = [1, 1, 1]} : vector<1x4x128xf32> to vector<1x3x128xf32>
    %68 = vector.extract_strided_slice %61 {offsets = [0, 3, 0], sizes = [1, 1, 128], strides = [1, 1, 1]} : vector<1x4x128xf32> to vector<1x1x128xf32>
    %69 = tpu.concatenate %67, %68 in 1 : vector<1x3x128xf32>, vector<1x1x128xf32> -> vector<1x4x128xf32>
    %70 = vector.shape_cast %18 : vector<4x128xi1> to vector<1x4x128xi1>
    %71 = arith.select %70, %69, %61 : vector<1x4x128xi1>, vector<1x4x128xf32>
    %72 = vector.shape_cast %22 : vector<4x128xi1> to vector<1x4x128xi1>
    %73 = arith.select %72, %71, %66 : vector<1x4x128xi1>, vector<1x4x128xf32>
    %74 = vector.shape_cast %26 : vector<4x128xi1> to vector<1x4x128xi1>
    %75 = arith.select %74, %66, %71 : vector<1x4x128xi1>, vector<1x4x128xf32>
    %76 = arith.subf %59, %57 : vector<1x4x128xf32>
    %77 = math.absf %76 : vector<1x4x128xf32>
    %78 = arith.subf %75, %73 : vector<1x4x128xf32>
    %79 = math.absf %78 : vector<1x4x128xf32>
    %80 = arith.addf %77, %79 : vector<1x4x128xf32>
    %cst_30 = arith.constant 5.000000e-01 : f32
    %81 = vector.broadcast %cst_30 : f32 to vector<1x4x128xf32>
    %82 = arith.mulf %81, %80 : vector<1x4x128xf32>
    %83 = math.roundeven %82 : vector<1x4x128xf32>
    %cst_31 = arith.constant 1.000000e+01 : f32
    %84 = vector.broadcast %cst_31 : f32 to vector<1x4x128xf32>
    %85 = arith.cmpf ogt, %83, %84 : vector<1x4x128xf32>
    %cst_32 = arith.constant 1.000000e+00 : f32
    %cst_33 = arith.constant 0.000000e+00 : f32
    %86 = vector.broadcast %cst_32 : f32 to vector<1x4x128xf32>
    %87 = vector.broadcast %cst_33 : f32 to vector<1x4x128xf32>
    %88 = arith.select %85, %86, %87 : vector<1x4x128xi1>, vector<1x4x128xf32>
    %c1_i32_34 = arith.constant 1 : i32
    %89 = tpu.dynamic_rotate %88 by %c1_i32_34 dim 2 : vector<1x4x128xf32>, i32 -> vector<1x4x128xf32>
    %c127_i32_35 = arith.constant 127 : i32
    %90 = tpu.dynamic_rotate %88 by %c127_i32_35 dim 2 : vector<1x4x128xf32>, i32 -> vector<1x4x128xf32>
    %91 = vector.shape_cast %6 : vector<4x128xi1> to vector<1x4x128xi1>
    %92 = arith.select %91, %90, %89 : vector<1x4x128xi1>, vector<1x4x128xf32>
    %93 = vector.shape_cast %10 : vector<4x128xi1> to vector<1x4x128xi1>
    %94 = arith.select %93, %89, %90 : vector<1x4x128xi1>, vector<1x4x128xf32>
    %95 = arith.maximumf %92, %94 : vector<1x4x128xf32>
    %96 = arith.maximumf %88, %95 : vector<1x4x128xf32>
    %c16_i32_36 = arith.constant 16 : i32
    %97 = tpu.dynamic_rotate %96 by %c16_i32_36 dim 2 : vector<1x4x128xf32>, i32 -> vector<1x4x128xf32>
    %c112_i32_37 = arith.constant 112 : i32
    %98 = tpu.dynamic_rotate %96 by %c112_i32_37 dim 2 : vector<1x4x128xf32>, i32 -> vector<1x4x128xf32>
    %99 = vector.extract_strided_slice %97 {offsets = [0, 0, 0], sizes = [1, 1, 128], strides = [1, 1, 1]} : vector<1x4x128xf32> to vector<1x1x128xf32>
    %100 = vector.extract_strided_slice %97 {offsets = [0, 0, 0], sizes = [1, 3, 128], strides = [1, 1, 1]} : vector<1x4x128xf32> to vector<1x3x128xf32>
    %101 = tpu.concatenate %99, %100 in 1 : vector<1x1x128xf32>, vector<1x3x128xf32> -> vector<1x4x128xf32>
    %102 = vector.shape_cast %14 : vector<4x128xi1> to vector<1x4x128xi1>
    %103 = arith.select %102, %101, %97 : vector<1x4x128xi1>, vector<1x4x128xf32>
    %104 = vector.extract_strided_slice %98 {offsets = [0, 1, 0], sizes = [1, 3, 128], strides = [1, 1, 1]} : vector<1x4x128xf32> to vector<1x3x128xf32>
    %105 = vector.extract_strided_slice %98 {offsets = [0, 3, 0], sizes = [1, 1, 128], strides = [1, 1, 1]} : vector<1x4x128xf32> to vector<1x1x128xf32>
    %106 = tpu.concatenate %104, %105 in 1 : vector<1x3x128xf32>, vector<1x1x128xf32> -> vector<1x4x128xf32>
    %107 = vector.shape_cast %18 : vector<4x128xi1> to vector<1x4x128xi1>
    %108 = arith.select %107, %106, %98 : vector<1x4x128xi1>, vector<1x4x128xf32>
    %109 = vector.shape_cast %22 : vector<4x128xi1> to vector<1x4x128xi1>
    %110 = arith.select %109, %108, %103 : vector<1x4x128xi1>, vector<1x4x128xf32>
    %111 = vector.shape_cast %26 : vector<4x128xi1> to vector<1x4x128xi1>
    %112 = arith.select %111, %103, %108 : vector<1x4x128xi1>, vector<1x4x128xf32>
    %113 = arith.maximumf %110, %112 : vector<1x4x128xf32>
    %114 = arith.maximumf %96, %113 : vector<1x4x128xf32>
    %115 = vector.shape_cast %114 : vector<1x4x128xf32> to vector<1x1x4x128xf32>
    %116 = vector.broadcast %115 : vector<1x1x4x128xf32> to vector<1x3x4x128xf32>
    %117 = arith.mulf %34, %116 : vector<1x3x4x128xf32>
    %c0_38 = arith.constant 0 : index
    %c0_39 = arith.constant 0 : index
    %c0_40 = arith.constant 0 : index
    %c0_41 = arith.constant 0 : index
    %118 = vector.load %arg4[%c0_38, %c0_39, %c0_40, %c0_41] : memref<1x3x4x128xf32, #tpu.memory_space<vmem>>, vector<1x3x4x128xf32>
    %cst_42 = arith.constant 2.550000e+02 : f32
    %119 = vector.broadcast %cst_42 : f32 to vector<1x3x4x128xf32>
    %120 = arith.mulf %118, %119 : vector<1x3x4x128xf32>
    %cst_43 = arith.constant 0.000000e+00 : f32
    %cst_44 = arith.constant 2.550000e+02 : f32
    %121 = vector.broadcast %cst_43 : f32 to vector<1x3x4x128xf32>
    %122 = arith.maximumf %121, %120 : vector<1x3x4x128xf32>
    %123 = vector.broadcast %cst_44 : f32 to vector<1x3x4x128xf32>
    %124 = arith.minimumf %123, %122 : vector<1x3x4x128xf32>
    %125 = math.floor %124 : vector<1x3x4x128xf32>
    %126 = vector.extract_strided_slice %125 {offsets = [0, 0, 0, 0], sizes = [1, 1, 4, 128], strides = [1, 1, 1, 1]} : vector<1x3x4x128xf32> to vector<1x1x4x128xf32>
    %127 = vector.shape_cast %126 : vector<1x1x4x128xf32> to vector<1x4x128xf32>
    %cst_45 = arith.constant 4.899000e+03 : f32
    %128 = vector.broadcast %cst_45 : f32 to vector<1x4x128xf32>
    %129 = arith.mulf %127, %128 : vector<1x4x128xf32>
    %130 = vector.extract_strided_slice %125 {offsets = [0, 1, 0, 0], sizes = [1, 1, 4, 128], strides = [1, 1, 1, 1]} : vector<1x3x4x128xf32> to vector<1x1x4x128xf32>
    %131 = vector.shape_cast %130 : vector<1x1x4x128xf32> to vector<1x4x128xf32>
    %cst_46 = arith.constant 9.617000e+03 : f32
    %132 = vector.broadcast %cst_46 : f32 to vector<1x4x128xf32>
    %133 = arith.mulf %131, %132 : vector<1x4x128xf32>
    %134 = arith.addf %129, %133 : vector<1x4x128xf32>
    %135 = vector.extract_strided_slice %125 {offsets = [0, 2, 0, 0], sizes = [1, 1, 4, 128], strides = [1, 1, 1, 1]} : vector<1x3x4x128xf32> to vector<1x1x4x128xf32>
    %136 = vector.shape_cast %135 : vector<1x1x4x128xf32> to vector<1x4x128xf32>
    %cst_47 = arith.constant 1.868000e+03 : f32
    %137 = vector.broadcast %cst_47 : f32 to vector<1x4x128xf32>
    %138 = arith.mulf %136, %137 : vector<1x4x128xf32>
    %139 = arith.addf %134, %138 : vector<1x4x128xf32>
    %cst_48 = arith.constant 8.192000e+03 : f32
    %140 = vector.broadcast %cst_48 : f32 to vector<1x4x128xf32>
    %141 = arith.addf %139, %140 : vector<1x4x128xf32>
    %cst_49 = arith.constant 6.10351563E-5 : f32
    %142 = vector.broadcast %cst_49 : f32 to vector<1x4x128xf32>
    %143 = arith.mulf %141, %142 : vector<1x4x128xf32>
    %144 = math.floor %143 : vector<1x4x128xf32>
    %c1_i32_50 = arith.constant 1 : i32
    %145 = tpu.dynamic_rotate %144 by %c1_i32_50 dim 2 : vector<1x4x128xf32>, i32 -> vector<1x4x128xf32>
    %c127_i32_51 = arith.constant 127 : i32
    %146 = tpu.dynamic_rotate %144 by %c127_i32_51 dim 2 : vector<1x4x128xf32>, i32 -> vector<1x4x128xf32>
    %147 = vector.shape_cast %6 : vector<4x128xi1> to vector<1x4x128xi1>
    %148 = arith.select %147, %146, %145 : vector<1x4x128xi1>, vector<1x4x128xf32>
    %149 = vector.shape_cast %10 : vector<4x128xi1> to vector<1x4x128xi1>
    %150 = arith.select %149, %145, %146 : vector<1x4x128xi1>, vector<1x4x128xf32>
    %c16_i32_52 = arith.constant 16 : i32
    %151 = tpu.dynamic_rotate %144 by %c16_i32_52 dim 2 : vector<1x4x128xf32>, i32 -> vector<1x4x128xf32>
    %c112_i32_53 = arith.constant 112 : i32
    %152 = tpu.dynamic_rotate %144 by %c112_i32_53 dim 2 : vector<1x4x128xf32>, i32 -> vector<1x4x128xf32>
    %153 = vector.extract_strided_slice %151 {offsets = [0, 0, 0], sizes = [1, 1, 128], strides = [1, 1, 1]} : vector<1x4x128xf32> to vector<1x1x128xf32>
    %154 = vector.extract_strided_slice %151 {offsets = [0, 0, 0], sizes = [1, 3, 128], strides = [1, 1, 1]} : vector<1x4x128xf32> to vector<1x3x128xf32>
    %155 = tpu.concatenate %153, %154 in 1 : vector<1x1x128xf32>, vector<1x3x128xf32> -> vector<1x4x128xf32>
    %156 = vector.shape_cast %14 : vector<4x128xi1> to vector<1x4x128xi1>
    %157 = arith.select %156, %155, %151 : vector<1x4x128xi1>, vector<1x4x128xf32>
    %158 = vector.extract_strided_slice %152 {offsets = [0, 1, 0], sizes = [1, 3, 128], strides = [1, 1, 1]} : vector<1x4x128xf32> to vector<1x3x128xf32>
    %159 = vector.extract_strided_slice %152 {offsets = [0, 3, 0], sizes = [1, 1, 128], strides = [1, 1, 1]} : vector<1x4x128xf32> to vector<1x1x128xf32>
    %160 = tpu.concatenate %158, %159 in 1 : vector<1x3x128xf32>, vector<1x1x128xf32> -> vector<1x4x128xf32>
    %161 = vector.shape_cast %18 : vector<4x128xi1> to vector<1x4x128xi1>
    %162 = arith.select %161, %160, %152 : vector<1x4x128xi1>, vector<1x4x128xf32>
    %163 = vector.shape_cast %22 : vector<4x128xi1> to vector<1x4x128xi1>
    %164 = arith.select %163, %162, %157 : vector<1x4x128xi1>, vector<1x4x128xf32>
    %165 = vector.shape_cast %26 : vector<4x128xi1> to vector<1x4x128xi1>
    %166 = arith.select %165, %157, %162 : vector<1x4x128xi1>, vector<1x4x128xf32>
    %167 = arith.subf %150, %148 : vector<1x4x128xf32>
    %168 = math.absf %167 : vector<1x4x128xf32>
    %169 = arith.subf %166, %164 : vector<1x4x128xf32>
    %170 = math.absf %169 : vector<1x4x128xf32>
    %171 = arith.addf %168, %170 : vector<1x4x128xf32>
    %cst_54 = arith.constant 5.000000e-01 : f32
    %172 = vector.broadcast %cst_54 : f32 to vector<1x4x128xf32>
    %173 = arith.mulf %172, %171 : vector<1x4x128xf32>
    %174 = math.roundeven %173 : vector<1x4x128xf32>
    %cst_55 = arith.constant 1.000000e+01 : f32
    %175 = vector.broadcast %cst_55 : f32 to vector<1x4x128xf32>
    %176 = arith.cmpf ogt, %174, %175 : vector<1x4x128xf32>
    %cst_56 = arith.constant 1.000000e+00 : f32
    %cst_57 = arith.constant 0.000000e+00 : f32
    %177 = vector.broadcast %cst_56 : f32 to vector<1x4x128xf32>
    %178 = vector.broadcast %cst_57 : f32 to vector<1x4x128xf32>
    %179 = arith.select %176, %177, %178 : vector<1x4x128xi1>, vector<1x4x128xf32>
    %c1_i32_58 = arith.constant 1 : i32
    %180 = tpu.dynamic_rotate %179 by %c1_i32_58 dim 2 : vector<1x4x128xf32>, i32 -> vector<1x4x128xf32>
    %c127_i32_59 = arith.constant 127 : i32
    %181 = tpu.dynamic_rotate %179 by %c127_i32_59 dim 2 : vector<1x4x128xf32>, i32 -> vector<1x4x128xf32>
    %182 = vector.shape_cast %6 : vector<4x128xi1> to vector<1x4x128xi1>
    %183 = arith.select %182, %181, %180 : vector<1x4x128xi1>, vector<1x4x128xf32>
    %184 = vector.shape_cast %10 : vector<4x128xi1> to vector<1x4x128xi1>
    %185 = arith.select %184, %180, %181 : vector<1x4x128xi1>, vector<1x4x128xf32>
    %186 = arith.maximumf %183, %185 : vector<1x4x128xf32>
    %187 = arith.maximumf %179, %186 : vector<1x4x128xf32>
    %c16_i32_60 = arith.constant 16 : i32
    %188 = tpu.dynamic_rotate %187 by %c16_i32_60 dim 2 : vector<1x4x128xf32>, i32 -> vector<1x4x128xf32>
    %c112_i32_61 = arith.constant 112 : i32
    %189 = tpu.dynamic_rotate %187 by %c112_i32_61 dim 2 : vector<1x4x128xf32>, i32 -> vector<1x4x128xf32>
    %190 = vector.extract_strided_slice %188 {offsets = [0, 0, 0], sizes = [1, 1, 128], strides = [1, 1, 1]} : vector<1x4x128xf32> to vector<1x1x128xf32>
    %191 = vector.extract_strided_slice %188 {offsets = [0, 0, 0], sizes = [1, 3, 128], strides = [1, 1, 1]} : vector<1x4x128xf32> to vector<1x3x128xf32>
    %192 = tpu.concatenate %190, %191 in 1 : vector<1x1x128xf32>, vector<1x3x128xf32> -> vector<1x4x128xf32>
    %193 = vector.shape_cast %14 : vector<4x128xi1> to vector<1x4x128xi1>
    %194 = arith.select %193, %192, %188 : vector<1x4x128xi1>, vector<1x4x128xf32>
    %195 = vector.extract_strided_slice %189 {offsets = [0, 1, 0], sizes = [1, 3, 128], strides = [1, 1, 1]} : vector<1x4x128xf32> to vector<1x3x128xf32>
    %196 = vector.extract_strided_slice %189 {offsets = [0, 3, 0], sizes = [1, 1, 128], strides = [1, 1, 1]} : vector<1x4x128xf32> to vector<1x1x128xf32>
    %197 = tpu.concatenate %195, %196 in 1 : vector<1x3x128xf32>, vector<1x1x128xf32> -> vector<1x4x128xf32>
    %198 = vector.shape_cast %18 : vector<4x128xi1> to vector<1x4x128xi1>
    %199 = arith.select %198, %197, %189 : vector<1x4x128xi1>, vector<1x4x128xf32>
    %200 = vector.shape_cast %22 : vector<4x128xi1> to vector<1x4x128xi1>
    %201 = arith.select %200, %199, %194 : vector<1x4x128xi1>, vector<1x4x128xf32>
    %202 = vector.shape_cast %26 : vector<4x128xi1> to vector<1x4x128xi1>
    %203 = arith.select %202, %194, %199 : vector<1x4x128xi1>, vector<1x4x128xf32>
    %204 = arith.maximumf %201, %203 : vector<1x4x128xf32>
    %205 = arith.maximumf %187, %204 : vector<1x4x128xf32>
    %206 = vector.shape_cast %205 : vector<1x4x128xf32> to vector<1x1x4x128xf32>
    %207 = vector.broadcast %206 : vector<1x1x4x128xf32> to vector<1x3x4x128xf32>
    %208 = arith.mulf %125, %207 : vector<1x3x4x128xf32>
    %209 = arith.subf %83, %174 : vector<1x4x128xf32>
    %210 = math.absf %209 : vector<1x4x128xf32>
    %211 = arith.subf %117, %208 : vector<1x3x4x128xf32>
    %212 = math.absf %211 : vector<1x3x4x128xf32>
    %cst_62 = arith.constant dense<0.000000e+00> : vector<1x4x128xf32>
    %213 = vector.multi_reduction <add>, %212, %cst_62 [1] : vector<1x3x4x128xf32> to vector<1x4x128xf32>
    %c0_63 = arith.constant 0 : index
    %c0_64 = arith.constant 0 : index
    %c0_65 = arith.constant 0 : index
    %214 = vector.load %arg5[%c0_63, %c0_64, %c0_65] : memref<1x4x128xf32, #tpu.memory_space<vmem>>, vector<1x4x128xf32>
    %cst_66 = arith.constant dense<0.000000e+00> : vector<4x128xf32>
    %215 = vector.multi_reduction <add>, %210, %cst_66 [0] : vector<1x4x128xf32> to vector<4x128xf32>
    %216 = vector.shape_cast %215 : vector<4x128xf32> to vector<1x4x128xf32>
    %217 = arith.addf %214, %216 : vector<1x4x128xf32>
    %c0_67 = arith.constant 0 : index
    %c0_68 = arith.constant 0 : index
    %c0_69 = arith.constant 0 : index
    %218 = vector.load %arg5[%c0_67, %c0_68, %c0_69] : memref<1x4x128xf32, #tpu.memory_space<vmem>>, vector<1x4x128xf32>
    tpu.vector_store %arg5[%c0_67, %c0_68, %c0_69], %217 {strides = array<i32>} : memref<1x4x128xf32, #tpu.memory_space<vmem>>, vector<1x4x128xf32>,
    %c0_70 = arith.constant 0 : index
    %c0_71 = arith.constant 0 : index
    %c0_72 = arith.constant 0 : index
    %219 = vector.load %arg6[%c0_70, %c0_71, %c0_72] : memref<1x4x128xf32, #tpu.memory_space<vmem>>, vector<1x4x128xf32>
    %cst_73 = arith.constant dense<0.000000e+00> : vector<4x128xf32>
    %220 = vector.multi_reduction <add>, %213, %cst_73 [0] : vector<1x4x128xf32> to vector<4x128xf32>
    %221 = vector.shape_cast %220 : vector<4x128xf32> to vector<1x4x128xf32>
    %222 = arith.addf %219, %221 : vector<1x4x128xf32>
    %c0_74 = arith.constant 0 : index
    %c0_75 = arith.constant 0 : index
    %c0_76 = arith.constant 0 : index
    %223 = vector.load %arg6[%c0_74, %c0_75, %c0_76] : memref<1x4x128xf32, #tpu.memory_space<vmem>>, vector<1x4x128xf32>
    tpu.vector_store %arg6[%c0_74, %c0_75, %c0_76], %222 {strides = array<i32>} : memref<1x4x128xf32, #tpu.memory_space<vmem>>, vector<1x4x128xf32>,
    return
  }
  func.func @transform_0(%arg0: i32, %arg1: i32) -> (i32, i32, i32) {
    %c0_i32 = arith.constant 0 : i32
    %c0_i32_0 = arith.constant 0 : i32
    %c0_i32_1 = arith.constant 0 : i32
    %c0_i32_2 = arith.constant 0 : i32
    return %c0_i32, %c0_i32_0, %c0_i32_1 : i32, i32, i32
  }
  func.func @transform_1(%arg0: i32, %arg1: i32) -> (i32, i32, i32, i32) {
    %c1_i32 = arith.constant 1 : i32
    %0 = arith.muli %arg0, %c1_i32 : i32
    %1 = arith.addi %0, %arg1 : i32
    %c0_i32 = arith.constant 0 : i32
    %c0_i32_0 = arith.constant 0 : i32
    %c0_i32_1 = arith.constant 0 : i32
    %c0_i32_2 = arith.constant 0 : i32
    return %1, %c0_i32, %c0_i32_0, %c0_i32_1 : i32, i32, i32, i32
  }
  func.func @transform_2(%arg0: i32, %arg1: i32) -> (i32, i32, i32, i32) {
    %c1_i32 = arith.constant 1 : i32
    %0 = arith.muli %arg0, %c1_i32 : i32
    %1 = arith.addi %0, %arg1 : i32
    %c0_i32 = arith.constant 0 : i32
    %c0_i32_0 = arith.constant 0 : i32
    %c0_i32_1 = arith.constant 0 : i32
    %c0_i32_2 = arith.constant 0 : i32
    return %1, %c0_i32, %c0_i32_0, %c0_i32_1 : i32, i32, i32, i32
  }
  func.func @transform_3(%arg0: i32, %arg1: i32) -> (i32, i32, i32) {
    %c0_i32 = arith.constant 0 : i32
    %c0_i32_0 = arith.constant 0 : i32
    %c0_i32_1 = arith.constant 0 : i32
    return %arg0, %c0_i32, %c0_i32_0 : i32, i32, i32
  }
  func.func @transform_4(%arg0: i32, %arg1: i32) -> (i32, i32, i32) {
    %c0_i32 = arith.constant 0 : i32
    %c0_i32_0 = arith.constant 0 : i32
    %c0_i32_1 = arith.constant 0 : i32
    return %arg0, %c0_i32, %c0_i32_0 : i32, i32, i32
  }
}

</mosaic_0001>

<bundles_post_ra>
// kernel: color_sobel_loss_mean.1
= control target key start
LH: loop header
LB: loop body
LE: loop exit
PB: predicated region body
PF: predicated region fallthrough
CT: control target
= control target key end

     0   :  { %s337_s27 = smov 127   ;;  %s338_s28 = smov 1   ;;  %v339_v46 = vmov 0.0   ;;  %vm115_vm0 = vcmask 1040384   ;;  %vm121_vm1 = vcmask 1042432   ;;  %vm255_vm12 = vcmask 1043456   ;;  %s551_s2 = inlined_call_operand.vmem [shape: f32[1,3,4,128], index: 2, kind: input, shape index: {}]   ;;  %s552_s1 = inlined_call_operand.vmem [shape: f32[1,3,4,128], index: 1, kind: input, shape index: {}]   ;;  %s553_s3 = inlined_call_operand.vmem [shape: f32[1,4,128], index: 3, kind: output, shape index: {0}]   ;;  %s554_s4 = inlined_call_operand.vmem [shape: f32[1,4,128], index: 4, kind: output, shape index: {1}]   ;;  %s555_s0 = inlined_call_operand.vmem [shape: f32[6,4,128], index: 0, kind: input, shape index: {}]  }
   0x1   :  { %v164_v0 = vld [vmem:[%s551_s2] sm:$0xf]  ;;  %v165_v1 = vld [vmem:[%s551_s2 + $0x4] sm:$0xf]  ;;  %v166_v2 = vld [vmem:[%s551_s2 + $0x8] sm:$0xf] }
   0x2   :  { %v167_v3 = vmul.f32 255.0, %v164_v0  ;;  %v168_v4 = vmul.f32 255.0, %v165_v1  ;;  %v169_v5 = vmul.f32 255.0, %v166_v2  ;;  %v79_v6 = vld [vmem:[%s552_s1] sm:$0xf]  ;;  %s336_s2 = smov 112  }
   0x3   :  { %v80_v7 = vld [vmem:[%s552_s1 + $0x4] sm:$0xf]  ;;  %v81_v8 = vld [vmem:[%s552_s1 + $0x8] sm:$0xf]  ;;  %v82_v9 = vmul.f32 255.0, %v79_v6  ;;  %s335_s1 = smov 16  }
   0x4   :  { %v170_v10 = vmax.f32 %v167_v3, 0.0  ;;  %v171_v11 = vmax.f32 %v168_v4, 0.0  ;;  %v172_v12 = vmax.f32 %v169_v5, 0.0  ;;  %v83_v13 = vmul.f32 255.0, %v80_v7  ;;  %60 = vst [vmem:[%s553_s3] sm:$0xf] %v339_v46  ;;  %61 = vst [vmem:[%s554_s4] sm:$0xf] %v339_v46 }
   0x5   :  { %v84_v14 = vmul.f32 255.0, %v81_v8  ;;  %v85_v15 = vmax.f32 %v82_v9, 0.0  ;;  %v432_v50 = vld [vmem:[%s555_s0 + $0xc] sm:$0xf]  ;;  %v437_v51 = vld [vmem:[%s555_s0 + $0x8] sm:$0xf] }
   0x6   :  { %v383_v16 = vmin.f32 %v170_v10, 255.0  ;;  %v385_v17 = vmin.f32 %v171_v11, 255.0  ;;  %v387_v18 = vmin.f32 %v172_v12, 255.0  ;;  %v86_v19 = vmax.f32 %v83_v13, 0.0  ;;  %v442_v53 = vld [vmem:[%s555_s0 + $0x10] sm:$0xf] }
   0x7   :  { %v87_v20 = vmax.f32 %v84_v14, 0.0  ;;  %v389_v21 = vmin.f32 %v85_v15, 255.0  ;;  %v447_v55 = vld [vmem:[%s555_s0 + $0x14] sm:$0xf]  ;;  %vm72_vm2 = vcmp.ne.f32.partialorder %v432_v50, 0.0  ;;  %vm69_vm3 = vcmp.ne.f32.partialorder %v437_v51, 0.0 }
   0x8   :  { %v176_v22 = vfloor.f32 %v383_v16  ;;  %v177_v23 = vfloor.f32 %v385_v17  ;;  %v178_v24 = vfloor.f32 %v387_v18  ;;  %v394_v25 = vmin.f32 %v86_v19, 255.0  ;;  %v453_v57 = vld [vmem:[%s555_s0] sm:$0xf]  ;;  %v458_v58 = vld [vmem:[%s555_s0 + $0x4] sm:$0xf] }
   0x9   :  { %v396_v26 = vmin.f32 %v87_v20, 255.0  ;;  %v91_v27 = vfloor.f32 %v389_v21  ;;  %vm75_vm4 = vcmp.ne.f32.partialorder %v442_v53, 0.0  ;;  %vm78_vm5 = vcmp.ne.f32.partialorder %v447_v55, 0.0 }
   0xa   :  { %v179_v28 = vmul.f32 4899.0, %v176_v22  ;;  %v180_v29 = vmul.f32 9617.0, %v177_v23  ;;  %v182_v30 = vmul.f32 1868.0, %v178_v24  ;;  %v92_v31 = vfloor.f32 %v394_v25 }
   0xb   :  { %v93_v32 = vfloor.f32 %v396_v26  ;;  %v94_v33 = vmul.f32 4899.0, %v91_v27  ;;  %vm63_vm6 = vcmp.ne.f32.partialorder %v453_v57, 0.0  ;;  %vm66_vm7 = vcmp.ne.f32.partialorder %v458_v58, 0.0  ;;  %v265_v21 = vld [vmem:[%s554_s4] sm:$0xf] }
   0xc   :  { %v181_v34 = vadd.f32 %v180_v29, %v179_v28  ;;  %v95_v35 = vmul.f32 9617.0, %v92_v31 }
   0xd   :  { %v97_v36 = vmul.f32 1868.0, %v93_v32 }
   0xe   :  { %v183_v37 = vadd.f32 %v182_v30, %v181_v34  ;;  %v96_v38 = vadd.f32 %v95_v35, %v94_v33 }
  0x10   :  { %v184_v39 = vadd.f32 8192.0, %v183_v37  ;;  %v98_v40 = vadd.f32 %v97_v36, %v96_v38 }
  0x12   :  { %v185_v41 = vmul.f32 6.1035156e-05, %v184_v39  ;;  %v99_v42 = vadd.f32 8192.0, %v98_v40 }
  0x14   :  { %v186_v43 = vfloor.f32 %v185_v41  ;;  %v100_v44 = vmul.f32 6.1035156e-05, %v99_v42 }
  0x16   :  { %193 = vrot.lane.b32.xlu1 %v186_v43, %s335_s1  ;;  %v101_v45 = vfloor.f32 %v100_v44 }
  0x18   :  { %108 = vrot.lane.b32.xlu0 %v101_v45, %s335_s1 }
  0x1a   :  { %195 = vrot.lane.b32.xlu1 %v186_v43, %s336_s2 }
  0x1c   :  { %110 = vrot.lane.b32.xlu0 %v101_v45, %s336_s2 }
  0x1e   :  { %104 = vrot.lane.b32.xlu1 %v101_v45, %s337_s27 }
  0x20   :  { %102 = vrot.lane.b32.xlu0 %v101_v45, %s338_s28 }
  0x22   :  { %189 = vrot.lane.b32.xlu1 %v186_v43, %s337_s27 }
  0x24   :  { %187 = vrot.lane.b32.xlu0 %v186_v43, %s338_s28 }
  0x88   :  { %v194_v47 = vpop.permute.xlu1 %193 }
  0x89   :  { %v198_v48 = vrot.slane %v194_v47, 7 }
  0x8a   :  { %v109_v49 = vpop.permute.xlu0 %108 }
  0x8b   :  { %v113_v52 = vrot.slane %v109_v49, 7  ;;  %v200_v59 = vsel %vm115_vm0, %v194_v47, %v198_v48 }
  0x8c   :  { %v196_v54 = vpop.permute.xlu1 %195  ;;  %v201_v2 = vsel %vm69_vm3, %v200_v59, %v194_v47 }
  0x8d   :  { %v203_v56 = vrot.slane %v196_v54, 1  ;;  %v116_v61 = vsel %vm115_vm0, %v109_v49, %v113_v52 }
  0x8e   :  { %v111_v60 = vpop.permute.xlu0 %110  ;;  %v117_v4 = vsel %vm69_vm3, %v116_v61, %v109_v49 }
  0x8f   :  { %v205_v62 = vsel %vm121_vm1, %v203_v56, %v196_v54  ;;  %v119_v63 = vrot.slane %v111_v60, 1 }
  0x90   :  { %v206_v0 = vsel %vm72_vm2, %v205_v62, %v196_v54  ;;  %v105_v1 = vpop.permute.xlu1 %104 }
  0x91   :  { %v122_v3 = vsel %vm121_vm1, %v119_v63, %v111_v60  ;;  %v207_v5 = vsel %vm75_vm4, %v206_v0, %v201_v2  ;;  %v208_v6 = vsel %vm78_vm5, %v201_v2, %v206_v0 }
  0x92   :  { %v123_v7 = vsel %vm72_vm2, %v122_v3, %v111_v60  ;;  %v103_v8 = vpop.permute.xlu0 %102  ;;  %v211_v19 = vsub.f32 %v208_v6, %v207_v5 }
  0x93   :  { %v124_v9 = vsel %vm75_vm4, %v123_v7, %v117_v4  ;;  %v125_v10 = vsel %vm78_vm5, %v117_v4, %v123_v7  ;;  %v106_v11 = vsel %vm63_vm6, %v105_v1, %v103_v8  ;;  %v107_v12 = vsel %vm66_vm7, %v103_v8, %v105_v1  ;;  %v261_v1 = vld [vmem:[%s553_s3] sm:$0xf] }
  0x94   :  { %v128_v13 = vsub.f32 %v125_v10, %v124_v9  ;;  %v126_v14 = vsub.f32 %v107_v12, %v106_v11  ;;  %v190_v15 = vpop.permute.xlu1 %189  ;;  %v212_v38 = vand.u32 2147483647, %v211_v19 }
  0x96   :  { %v127_v20 = vand.u32 2147483647, %v126_v14  ;;  %v129_v28 = vand.u32 2147483647, %v128_v13  ;;  %v188_v29 = vpop.permute.xlu0 %187 }
  0x97   :  { %v191_v30 = vsel %vm63_vm6, %v190_v15, %v188_v29  ;;  %v192_v33 = vsel %vm66_vm7, %v188_v29, %v190_v15 }
  0x98   :  { %v130_v34 = vadd.f32 %v129_v28, %v127_v20  ;;  %v209_v35 = vsub.f32 %v192_v33, %v191_v30 }
  0x9a   :  { %v131_v36 = vmul.f32 0.5, %v130_v34  ;;  %v210_v37 = vand.u32 2147483647, %v209_v35 }
  0x9c   :  { %v296_v39 = vcvt.f32.s32 %v131_v36  ;;  %v213_v40 = vadd.f32 %v212_v38, %v210_v37  ;;  %v294_v43 = vand.u32 2147483647, %v131_v36  ;;  %v299_v44 = vand.u32 2147483648, %v131_v36 }
  0x9e   :  { %v297_v41 = vcvt.s32.f32 %v296_v39  ;;  %v214_v42 = vmul.f32 0.5, %v213_v40  ;;  %vm295_vm8 = vcmp.lt.f32.partialorder %v294_v43, 8388608.0 }
  0xa0   :  { %v304_v45 = vcvt.f32.s32 %v214_v42  ;;  %v298_v47 = vand.u32 2147483647, %v297_v41  ;;  %v302_v52 = vand.u32 2147483647, %v214_v42  ;;  %v307_v54 = vand.u32 2147483648, %v214_v42 }
  0xa2   :  { %v305_v48 = vcvt.s32.f32 %v304_v45  ;;  %v300_v49 = vor.u32 %v299_v44, %v298_v47  ;;  %vm303_vm10 = vcmp.lt.f32.partialorder %v302_v52, 8388608.0 }
  0xa4   :  { %v301_v56 = vsel %vm295_vm8, %v300_v49, %v131_v36  ;;  %v306_v59 = vand.u32 2147483647, %v305_v48 }
  0xa5   :  { %vm133_vm9 = vcmp.gt.f32.partialorder %v301_v56, 10.0 }
  0xa6   :  { %v308_v60 = vor.u32 %v307_v54, %v306_v59  ;;  %v134_v63 = vsel %vm133_vm9, 1.0, %v339_v46 }
  0xa8   :  { %v309_v61 = vsel %vm303_vm10, %v308_v60, %v214_v42 }
  0xa9   :  { %vm216_vm11 = vcmp.gt.f32.partialorder %v309_v61, 10.0  ;;  %v247_v62 = vsub.f32 %v301_v56, %v309_v61 }
  0xaa   :  { %v217_v0 = vsel %vm216_vm11, 1.0, %v339_v46 }
  0xab   :  { %v248_v2 = vand.u32 2147483647, %v247_v62  ;;  %v320_v3 = vpack.i.bf16 %v217_v0, %v134_v63 }
  0xad   :  { %v263_v4 = vadd.f32 %v261_v1, %v248_v2  ;;  %321 = vrot.lane.b32.xlu1 %v320_v3, %s337_s27  ;;  %316 = vrot.lane.b32.xlu0 %v320_v3, %s338_s28 }
  0xaf   :  { %264 = vst [vmem:[%s553_s3] sm:$0xf] %v263_v4 }
 0x11f   :  { %v322_v5 = vpop.permute.xlu1 %321  ;;  %v317_v6 = vpop.permute.xlu0 %316 }
 0x120   :  { %v324_v7 = vunpack.i.h.bf16 %v322_v5  ;;  %v323_v8 = vunpack.i.l.bf16 %v322_v5  ;;  %v319_v46 = vunpack.i.h.bf16 %v317_v6  ;;  %v318_v9 = vunpack.i.l.bf16 %v317_v6 }
 0x122   :  { %v222_v10 = vsel %vm63_vm6, %v324_v7, %v319_v46  ;;  %v223_v11 = vsel %vm66_vm7, %v319_v46, %v324_v7  ;;  %v139_v12 = vsel %vm63_vm6, %v323_v8, %v318_v9  ;;  %v140_v13 = vsel %vm66_vm7, %v318_v9, %v323_v8 }
 0x123   :  { %v224_v14 = vmax.f32 %v222_v10, %v223_v11  ;;  %v141_v15 = vmax.f32 %v139_v12, %v140_v13 }
 0x125   :  { %v142_v19 = vmax.f32 %v134_v63, %v141_v15  ;;  %v225_v20 = vmax.f32 %v217_v0, %v224_v14 }
 0x127   :  { %v330_v28 = vpack.i.bf16 %v225_v20, %v142_v19 }
 0x129   :  { %331 = vrot.lane.b32.xlu1 %v330_v28, %s336_s2  ;;  %326 = vrot.lane.b32.xlu0 %v330_v28, %s335_s1 }
 0x19b   :  { %v332_v29 = vpop.permute.xlu1 %331  ;;  %v327_v30 = vpop.permute.xlu0 %326 }
 0x19c   :  { %v334_v33 = vunpack.i.h.bf16 %v332_v29  ;;  %v333_v34 = vunpack.i.l.bf16 %v332_v29  ;;  %v329_v35 = vunpack.i.h.bf16 %v327_v30  ;;  %v328_v36 = vunpack.i.l.bf16 %v327_v30 }
 0x19e   :  { %v236_v57 = vrot.slane %v334_v33, 1  ;;  %v153_v37 = vrot.slane %v333_v34, 1  ;;  %v231_v38 = vrot.slane %v329_v35, 7  ;;  %v148_v58 = vrot.slane %v328_v36, 7 }
 0x1a0   :  { %v238_v39 = vsel %vm121_vm1, %v236_v57, %v334_v33  ;;  %v155_v40 = vsel %vm121_vm1, %v153_v37, %v333_v34  ;;  %v233_v41 = vsel %vm115_vm0, %v329_v35, %v231_v38  ;;  %v150_v42 = vsel %vm115_vm0, %v328_v36, %v148_v58 }
 0x1a1   :  { %v239_v43 = vsel %vm72_vm2, %v238_v39, %v334_v33  ;;  %v156_v44 = vsel %vm72_vm2, %v155_v40, %v333_v34  ;;  %v234_v45 = vsel %vm69_vm3, %v233_v41, %v329_v35  ;;  %v151_v47 = vsel %vm69_vm3, %v150_v42, %v328_v36 }
 0x1a2   :  { %v240_v48 = vsel %vm75_vm4, %v239_v43, %v234_v45  ;;  %v241_v49 = vsel %vm78_vm5, %v234_v45, %v239_v43  ;;  %v157_v52 = vsel %vm75_vm4, %v156_v44, %v151_v47  ;;  %v158_v54 = vsel %vm78_vm5, %v151_v47, %v156_v44 }
 0x1a3   :  { %v242_v50 = vmax.f32 %v240_v48, %v241_v49  ;;  %v159_v56 = vmax.f32 %v157_v52, %v158_v54 }
 0x1a5   :  { %v243_v59 = vmax.f32 %v225_v20, %v242_v50  ;;  %v160_v60 = vmax.f32 %v142_v19, %v159_v56 }
 0x1a7   :  { %v244_v51 = vmul.f32 %v243_v59, %v176_v22  ;;  %v245_v61 = vmul.f32 %v243_v59, %v177_v23  ;;  %v246_v62 = vmul.f32 %v243_v59, %v178_v24  ;;  %v161_v53 = vmul.f32 %v160_v60, %v91_v27 }
 0x1a8   :  { %v162_v55 = vmul.f32 %v160_v60, %v92_v31  ;;  %v163_v63 = vmul.f32 %v160_v60, %v93_v32 }
 0x1a9   :  { %v249_v0 = vsub.f32 %v161_v53, %v244_v51 }
 0x1aa   :  { %v250_v1 = vsub.f32 %v162_v55, %v245_v61  ;;  %v251_v16 = vsub.f32 %v163_v63, %v246_v62 }
 0x1ab   :  { %v252_v22 = vand.u32 2147483647, %v249_v0 }
 0x1ac   :  { %v253_v2 = vand.u32 2147483647, %v250_v1  ;;  %v254_v17 = vand.u32 2147483647, %v251_v16 }
 0x1ad   :  { %v256_v23 = vsel %vm255_vm12, %v252_v22, 0.0 }
 0x1ae   :  { %v257_v3 = vsel %vm255_vm12, %v253_v2, 0.0  ;;  %v259_v24 = vsel %vm255_vm12, %v254_v17, 0.0 }
 0x1af   :  { %v258_v18 = vadd.f32 %v257_v3, %v256_v23 }
 0x1b1   :  { %v260_v25 = vadd.f32 %v259_v24, %v258_v18 }
 0x1b3   :  { %v267_v27 = vadd.f32 %v265_v21, %v260_v25 }
 0x1b5   :  { %268 = vst [vmem:[%s554_s4] sm:$0xf] %v267_v27 }

</bundles_post_ra>
